<compile_context>
chip_gen: v7x
topology: tpu7x:2x2x1
jax: 0.10.0
libtpu: 0.0.40
codegen_flags: <defaults>
</compile_context>

<pallas_src>
import math

import jax
import jax.numpy as jnp
from jax.experimental import pallas as pl
from jax.experimental.pallas import tpu as pltpu


def _interp_kernel(x_ref, y_ref):
    """One (TB, n) -> (TB, n+1) row-tile of the vertex interpolation."""
    x = x_ref[...].astype(jnp.float32)              # (TB, n), compute in f32
    n = x.shape[-1]
    # xr[:, j] = x[:, j-1]; xr[:, 0] wraps to x[:, n-1] (reused for vertex n).
    xr = pltpu.roll(x, shift=1, axis=1)
    # Lane-aligned full-width interior store (column 0 fixed right after).
    y_ref[:, 0:n] = 0.5 * (x + xr)
    y_ref[:, 0:1] = x[:, 0:1]                        # vertex 0 = x[..., 0]
    y_ref[:, n:n + 1] = xr[:, 0:1]                   # vertex n = x[..., n-1]


def _interp_ref(x):
    """Pure-JAX reference / fallback (XLA fuses this for free). f32 output."""
    x = x.astype(jnp.float32)
    return jnp.concatenate(
        [x[..., :1], 0.5 * (x[..., :-1] + x[..., 1:]), x[..., -1:]], axis=-1)


def _sublane_align(dtype):
    size = jnp.dtype(dtype).itemsize
    if size >= 4:
        return 8
    if size == 2:
        return 16
    return 32


# generation -> (double-buffered in+out footprint cap, vmem_limit_bytes)
_GEN_VMEM = {
    "v5e": (16 << 20, 28 << 20),
    "v6e": (32 << 20, 48 << 20),
    "v7x": (40 << 20, 48 << 20),   # only 64 MiB physical VMEM per TensorCore
}
# Unknown chip: stay inside every generation's default scoped VMEM (16 MiB).
_GEN_VMEM_DEFAULT = (12 << 20, None)


def _tpu_generation():
    try:
        kind = jax.devices()[0].device_kind.lower()
    except Exception:
        return None
    if "v5 lite" in kind or "v5lite" in kind or "v5e" in kind:
        return "v5e"
    if "v6" in kind or "trillium" in kind:
        return "v6e"
    if "v7" in kind or "7x" in kind:
        return "v7x"
    return None


def volume_to_vertex_interpolate_1d(x, *, block_rows=None,
                                    min_elements_for_pallas=1 << 18,
                                    min_lanes_for_pallas=128):
    """JAX/Pallas equivalent of VolumeToVertexInterpolator1d.forward (f32 out)."""
    # Keep f32/bf16 native in HBM (cast to f32 happens in-kernel); anything
    # else (ints, f16, f64) is promoted to f32 up front.
    if x.dtype not in (jnp.float32, jnp.bfloat16):
        x = x.astype(jnp.float32)

    lead = x.shape[:-1]
    n = x.shape[-1]

    # Tiny problems are launch-overhead dominated, and below 128 lanes the
    # vreg/VMEM rows are mostly padding with masked stores -> fused JAX path
    # matches or beats the kernel.
    if x.size < min_elements_for_pallas or n < min_lanes_for_pallas:
        return _interp_ref(x)

    batch = math.prod(lead) if lead else 1
    x2d = x.reshape(batch, n)

    gen = _tpu_generation()
    footprint_cap, vmem_limit = _GEN_VMEM.get(gen, _GEN_VMEM_DEFAULT)

    in_item = jnp.dtype(x.dtype).itemsize
    out_item = 4                                   # output is always float32
    align = max(_sublane_align(x.dtype), 8)
    # Bytes per row of the double-buffered (in + out) tile pair.
    per_row = 2 * (n * in_item + (n + 1) * out_item)

    # Very wide n: even an `align`-row double-buffered tile blows the budget.
    # TODO(synk): lane-tile wide n with a 1-column halo instead of falling back.
    if block_rows is None and align * per_row > footprint_cap:
        return _interp_ref(x)

    if block_rows is None:
        tb = footprint_cap // per_row
        tb = max(align, tb - tb % align)
        # Keep >= ~4 grid steps so DMA-in / compute / writeback overlap even
        # for mid-sized inputs between the fallback threshold and ~4 MiB.
        if batch > 4 * align:
            quarter = -(-batch // 4)
            quarter = -(-quarter // align) * align
            tb = min(tb, quarter)
    else:
        tb = int(block_rows)
    tb = min(tb, batch)
    if tb < batch:
        tb = max(align, tb - tb % align)           # sublane-aligned when tiling

    steps = -(-batch // tb)
    grid = (steps,)

    # v7x has 2 TensorCores per chip; CORE_PARALLEL splits the (independent)
    # row-tile axis across them.  Plain "parallel" elsewhere (1 TC).
    if gen == "v7x" and steps >= 2:
        dim_sem = (pltpu.CORE_PARALLEL,)
    else:
        dim_sem = ("parallel",)

    cp_kwargs = dict(dimension_semantics=dim_sem)
    if vmem_limit is not None:
        needed = tb * per_row + (2 << 20)          # actual footprint + headroom
        cp_kwargs["vmem_limit_bytes"] = int(max(vmem_limit, needed))
    compiler_params = pltpu.CompilerParams(**cp_kwargs)

    cost = pl.CostEstimate(
        flops=2 * batch * (n + 1),
        transcendentals=0,
        bytes_accessed=batch * (n * in_item + (n + 1) * out_item),
    )

    y2d = pl.pallas_call(
        _interp_kernel,
        out_shape=jax.ShapeDtypeStruct((batch, n + 1), jnp.float32),
        grid=grid,
        in_specs=[pl.BlockSpec((tb, n), lambda i: (i, 0))],
        out_specs=pl.BlockSpec((tb, n + 1), lambda i: (i, 0)),
        compiler_params=compiler_params,
        cost_estimate=cost,
    )(x2d)

    return y2d.reshape(lead + (n + 1,))


if __name__ == "__main__":
    key = jax.random.PRNGKey(0)
    k1, k2, k3 = jax.random.split(key, 3)

    # 1) Small shape consistent with the module (batch=2, channels=4, n=16):
    #    default dispatch -> fused pure-JAX fallback (n < 128).
    x_small = jax.random.normal(k1, (2, 4, 16), dtype=jnp.float32)
    y_small = jax.block_until_ready(volume_to_vertex_interpolate_1d(x_small))
    assert y_small.shape == (2, 4, 17), y_small.shape
    assert y_small.dtype == jnp.float32
    assert jnp.allclose(y_small, _interp_ref(x_small), atol=1e-6, rtol=1e-6)

    # 2) Same small shape, Pallas kernel path forced (single block).
    y_small_k = jax.block_until_ready(
        volume_to_vertex_interpolate_1d(
            x_small, min_elements_for_pallas=0, min_lanes_for_pallas=0))
    assert y_small_k.shape == (2, 4, 17), y_small_k.shape
    assert jnp.allclose(y_small_k, _interp_ref(x_small), atol=1e-6, rtol=1e-6)

    # 3) Small-but-tiled f32 case exercising the pipelined grid:
    #    batch rows = 4*64 = 256, block_rows = 64 -> 4 grid steps.
    x_med = jax.random.normal(k2, (4, 64, 256), dtype=jnp.float32)
    y_med = jax.block_until_ready(
        volume_to_vertex_interpolate_1d(
            x_med, block_rows=64,
            min_elements_for_pallas=0, min_lanes_for_pallas=0))
    assert y_med.shape == (4, 64, 257), y_med.shape
    assert jnp.allclose(y_med, _interp_ref(x_med), atol=1e-6, rtol=1e-6)

    # 4) bf16 input (packed-sublane alignment path, f32 output), 8 grid steps.
    x_bf = jax.random.normal(k3, (2, 128, 256), dtype=jnp.float32).astype(jnp.bfloat16)
    y_bf = jax.block_until_ready(
        volume_to_vertex_interpolate_1d(
            x_bf, block_rows=32,
            min_elements_for_pallas=0, min_lanes_for_pallas=0))
    assert y_bf.shape == (2, 128, 257), y_bf.shape
    assert y_bf.dtype == jnp.float32
    assert jnp.allclose(y_bf, _interp_ref(x_bf), atol=1e-6, rtol=1e-6)

    print("KERNEL_OK")
</pallas_src>

<mosaic_0001>
module attributes {stable_mosaic.version = 11 : i64} {
  func.func @_interp_kernel(%arg0: i32, %arg1: memref<8x16xf32, #tpu.memory_space<vmem>>, %arg2: memref<8x17xf32, #tpu.memory_space<vmem>>) attributes {dimension_semantics = [#tpu.dimension_semantics<parallel>], iteration_bounds = array<i64: 1>, scalar_prefetch = 0 : i64, scratch_operands = 0 : i64, tpu.core_type = #tpu.core_type<tc>, window_params = [{transform_indices = @transform_0, window_bounds = array<i64: 8, 16>}, {transform_indices = @transform_1, window_bounds = array<i64: 8, 17>}]} {
    %c0 = arith.constant 0 : index
    %c0_0 = arith.constant 0 : index
    %0 = vector.load %arg1[%c0, %c0_0] : memref<8x16xf32, #tpu.memory_space<vmem>>, vector<8x16xf32>
    %c1_i32 = arith.constant 1 : i32
    %1 = tpu.dynamic_rotate %0 by %c1_i32 dim 1 : vector<8x16xf32>, i32 -> vector<8x16xf32>
    %2 = arith.addf %0, %1 : vector<8x16xf32>
    %cst = arith.constant 5.000000e-01 : f32
    %3 = vector.broadcast %cst : f32 to vector<8x16xf32>
    %4 = arith.mulf %3, %2 : vector<8x16xf32>
    %c0_1 = arith.constant 0 : index
    %c0_2 = arith.constant 0 : index
    %5 = vector.load %arg2[%c0_1, %c0_2] : memref<8x17xf32, #tpu.memory_space<vmem>>, vector<8x16xf32>
    tpu.vector_store %arg2[%c0_1, %c0_2], %4 {strides = array<i32>} : memref<8x17xf32, #tpu.memory_space<vmem>>, vector<8x16xf32>,
    %6 = vector.extract_strided_slice %0 {offsets = [0, 0], sizes = [8, 1], strides = [1, 1]} : vector<8x16xf32> to vector<8x1xf32>
    %c0_3 = arith.constant 0 : index
    %c0_4 = arith.constant 0 : index
    %7 = vector.load %arg2[%c0_3, %c0_4] : memref<8x17xf32, #tpu.memory_space<vmem>>, vector<8x1xf32>
    tpu.vector_store %arg2[%c0_3, %c0_4], %6 {strides = array<i32>} : memref<8x17xf32, #tpu.memory_space<vmem>>, vector<8x1xf32>,
    %8 = vector.extract_strided_slice %1 {offsets = [0, 0], sizes = [8, 1], strides = [1, 1]} : vector<8x16xf32> to vector<8x1xf32>
    %c0_5 = arith.constant 0 : index
    %c16 = arith.constant 16 : index
    %9 = vector.load %arg2[%c0_5, %c16] : memref<8x17xf32, #tpu.memory_space<vmem>>, vector<8x1xf32>
    tpu.vector_store %arg2[%c0_5, %c16], %8 {strides = array<i32>} : memref<8x17xf32, #tpu.memory_space<vmem>>, vector<8x1xf32>,
    return
  }
  func.func @transform_0(%arg0: i32) -> (i32, i32) {
    %c0_i32 = arith.constant 0 : i32
    %c0_i32_0 = arith.constant 0 : i32
    return %arg0, %c0_i32 : i32, i32
  }
  func.func @transform_1(%arg0: i32) -> (i32, i32) {
    %c0_i32 = arith.constant 0 : i32
    %c0_i32_0 = arith.constant 0 : i32
    return %arg0, %c0_i32 : i32, i32
  }
}

</mosaic_0001>

<bundles_post_ra>
// kernel: tpu_custom_call.1
= control target key start
LH: loop header
LB: loop body
LE: loop exit
PB: predicated region body
PF: predicated region fallthrough
CT: control target
= control target key end

     0   :  { %6 = vsyncpa [#allocation3], 0  ;;  %s151_s0 = inlined_call_operand.hbm [shape: f32[8,16], index: 0, kind: input, shape index: {}]   ;;  %s152_s1 = inlined_call_operand.hbm [shape: f32[8,17], index: 1, kind: output, shape index: {}]  }
   0x1   :  { %7 = vsyncpa [#allocation4], 0  ;;  %s112_s6 = smov [#allocation2]   ;;  %s64_s10 = scalar_lea.hbm %s151_s0, 128 }
   0x2   :  { %s14_s7 = sshll.u32 %s112_s6, 4  ;;  %p65_p0 = scmp.ne.s32.totalorder %s151_s0, %s64_s10  ;;  %s15_s7 = int_to_ptr.vmem [resolvable:$true] %s14_s7 }
   0x3   :  { %p68_p1 = scmp.lt.u32.totalorder %s64_s10, %s151_s0 }
   0x5   :  { %p70_p2 = pnand %p68_p1, %p65_p0 }
   0x7   :  { %73 = shalt.err (!%p70_p2)
}
   0x8   :  { %s74_s15 = scalar_lea.vmem %s15_s7, 128  ;;  %p79_p4 = scmp.lt.s32.totalorder %s15_s7, %s15_s7 }
   0x9   :  { %p75_p3 = scmp.ne.s32.totalorder %s15_s7, %s74_s15  ;;  %p80_p5 = scmp.lt.s32.totalorder %s74_s15, %s74_s15 }
   0xb   :  { %p81_p6 = por %p80_p5, %p79_p4 }
   0xd   :  { %p82_p7 = pnand %p81_p6, %p75_p3 }
   0xf   :  { %85 = shalt.err (!%p82_p7)
}
  0x10   :  { %17 = dma.hbm_to_vmem [thread:$0]  %s151_s0, 128, %s15_s7, [#allocation3]  }
  0x11   :  { %108 = dma.done.wait [#allocation3], 128  }
  0x12   :  { %109 = vsyncadd [#allocation3], 4294967168  ;;  %v21_v0 = vld [vmem:[#allocation2] sm:$0xff]  ;;  %s113_s18 = smov 16   ;;  %vm22_vm0 = vcmask 1047680   ;;  %s114_s19 = smov 113  }
  0x13   :  { %23 = vrot.lane.b32.xlu0 %v21_v0, %s113_s18  ;;  %s115_s20 = smov 1   ;;  %vm35_vm1 = vcmask 130048   ;;  %s116_s21 = smov [#allocation5]   ;;  %vm37_vm2 = vcmask 7168   ;;  %vm42_vm3 = vcmask 138368  }
  0x14   :  { %s50_s0 = sshll.u32 %s116_s21, 4  ;;  %s51_s0 = int_to_ptr.vmem [resolvable:$true] %s50_s0 }
  0x15   :  { %s86_s22 = scalar_lea.vmem %s51_s0, 128  ;;  %p91_p9 = scmp.lt.s32.totalorder %s51_s0, %s51_s0 }
  0x16   :  { %p87_p8 = scmp.ne.s32.totalorder %s51_s0, %s86_s22  ;;  %p92_p10 = scmp.lt.s32.totalorder %s86_s22, %s86_s22 }
  0x18   :  { %p93_p11 = por %p92_p10, %p91_p9 }
  0x1a   :  { %p94_p12 = pnand %p93_p11, %p87_p8 }
  0x85   :  { %v24_v1 = vpop.permute.xlu0 %23 }
  0x86   :  { %v25_v2 = vsel %vm22_vm0, %v24_v1, %v21_v0 }
  0x87   :  { %26 = vrot.lane.b32.xlu0 %v25_v2, %s113_s18 }
  0xf9   :  { %v27_v3 = vpop.permute.xlu0 %26 }
  0xfa   :  { %v28_v4 = vsel %vm22_vm0, %v27_v3, %v21_v0 }
  0xfb   :  { %30 = vrot.lane.b32.xlu1 %v28_v4, %s114_s19 }
  0xff   :  { %39 = vrot.lane.b32.xlu1 %v28_v4, %s115_s20 }
 0x16d   :  { %v31_v5 = vpop.permute.xlu1 %30 }
 0x16e   :  { %v33_v6 = vadd.f32 %v31_v5, %v21_v0 }
 0x170   :  { %v34_v7 = vmul.f32 0.5, %v33_v6 }
 0x171   :  { %v40_v8 = vpop.permute.xlu1 %39 }
 0x172   :  { %36 = vst.msk [vmem:[#allocation5] sm:$0xff] %vm35_vm1, %v34_v7 }
 0x173   :  { %38 = vst.msk [vmem:[#allocation5] sm:$0xff] %vm37_vm2, %v21_v0 }
 0x174   :  { %43 = vst.msk [vmem:[#allocation5] sm:$0xff] %vm42_vm3, %v40_v8 }
 0x175   :  { %97 = shalt.err (!%p94_p12)
}
 0x176   :  { %s98_s25 = scalar_lea.hbm %s152_s1, 128 }
 0x177   :  { %p99_p13 = scmp.ne.s32.totalorder %s152_s1, %s98_s25  ;;  %p102_p0 = scmp.lt.u32.totalorder %s98_s25, %s152_s1 }
 0x179   :  { %p104_p1 = pnand %p102_p0, %p99_p13 }
 0x17b   :  { %107 = shalt.err (!%p104_p1)
}
 0x17c   :  { %53 = dma.vmem_to_hbm [thread:$0]  %s51_s0, 128, %s152_s1, [#allocation4]  }
 0x17d   :  { %110 = dma.done.wait [#allocation4], 128  }
 0x17e   :  { %111 = vsyncadd [#allocation4], 4294967168 }
 0x17f   :  { %57 = vsyncpa [#allocation3], 1 }
 0x180   :  { %58 = vsyncpa [#allocation4], 1 }

</bundles_post_ra>
